<compile_context>
chip_gen: v5e
topology: v5e:2x2
jax: 0.10.0
libtpu: 0.0.40
codegen_flags: <defaults>
</compile_context>

<pallas_src>
import functools

import jax
import jax.numpy as jnp
from jax.experimental import pallas as pl
from jax.experimental.pallas import tpu as pltpu


def _attention_kernel(z_ref, w1_ref, b1_ref, w2_ref, res_ref, beta_ref,
                      *, unroll_weighted_sum):
    # z_ref   : (TB, N, D)   TB batch elements per grid step (native dtype)
    # w1_ref  : (D, H)       first linear weight (in, out layout)
    # b1_ref  : (1, H)       first linear bias
    # w2_ref  : (1, H)       second linear weight (no bias), as a row vector
    # res_ref : (TB, D) or (1, 1, TB*D)   attention-pooled output
    # beta_ref: (TB, N) or (1, 1, TB*N)   softmax attention weights (f32)
    TB, N, D = z_ref.shape

    z = z_ref[...]                                    # (TB, N, D) native dtype
    zf = z.reshape(TB * N, D)                         # merge leading dims

    # Hidden layer: tanh(z @ W1 + b1). One (TB*N, D) @ (D, H) MXU matmul with
    # f32 accumulation; bias add + tanh in f32.
    h = jnp.tanh(
        jnp.dot(zf, w1_ref[...], preferred_element_type=jnp.float32)
        + b1_ref[...].astype(jnp.float32)             # (1, H) broadcasts
    )                                                 # (TB*N, H) f32

    # Scalar score per set element: VPU multiply + lane reduction on the 2-D h
    # (no 3-D reshape of the large activation; only the tiny logits reshape).
    w2_row = w2_ref[...].astype(jnp.float32)          # (1, H)
    logits = jnp.sum(h * w2_row, axis=-1, keepdims=True)   # (TB*N, 1)
    logits = logits.reshape(TB, N)                    # tiny relayout only

    # Softmax over the set axis (dim=1 of the original (B, N, 1) scores),
    # per batch row. Exact normalization (approx reciprocal was out of spec).
    m = jnp.max(logits, axis=-1, keepdims=True)       # (TB, 1)
    e = jnp.exp(logits - m)                           # (TB, N)
    beta = e / jnp.sum(e, axis=-1, keepdims=True)     # (TB, N) f32

    # Weighted sum over the set axis.
    if unroll_weighted_sum:
        # Static unroll over small N: live state is a single (TB, D) f32
        # accumulator; no (TB, N, D) f32 broadcast product materialized.
        acc = jnp.zeros((TB, D), jnp.float32)
        for n in range(N):
            acc = acc + beta[:, n:n + 1] * z[:, n, :]
        res = acc
    else:
        # Large-N fallback: broadcast multiply promotes to f32 in-place
        # (no explicit astype copy of the z tile).
        res = jnp.sum(beta[:, :, None] * z, axis=1)   # (TB, D) f32

    # Lane-dense stores: if the wrapper chose flattened output slabs, the
    # reshape below retargets the (TB, D)/(TB, N) results onto them; otherwise
    # it is the identity.
    res_ref[...] = res.reshape(res_ref.shape).astype(res_ref.dtype)
    beta_ref[...] = beta.reshape(beta_ref.shape).astype(beta_ref.dtype)


def _choose_tile_b(B, N, D, H, itemsize):
    """VMEM- and dtype-aware batch-tile selection.

    * targets a ~2 MiB z block (amortizes per-step pipeline overhead, keeps the
      HBM-bound z stream near roofline),
    * keeps the in-kernel working set (double-buffered z + f32 activations +
      outputs) under ~40 MiB -- safe for v7x's 64 MiB VMEM/core,
    * rounds TB to the dtype's sublane tile (8 for f32, 16 for bf16),
    * keeps >= 2 grid steps when the batch allows it, so the "parallel" batch
      axis can shard across both v7x TensorCores.
    """
    z_row_bytes = N * D * itemsize
    per_b_bytes = (2 * z_row_bytes          # double-buffered z input block
                   + N * H * 4              # f32 hidden activation
                   + 2 * N * D * 4          # f32 temporaries in the epilogue
                   + 2 * (D + N) * 4)       # double-buffered outputs
    target_z_bytes = 2 * 1024 * 1024        # ~1-4 MiB z block per grid step
    vmem_budget = 40 * 1024 * 1024          # v7x-safe working-set budget

    tb = min(max(1, target_z_bytes // max(z_row_bytes, 1)),
             max(1, vmem_budget // max(per_b_bytes, 1)),
             B)
    sub = 16 if itemsize < 4 else 8         # bf16 second-minor tiling is 16
    if tb < B:
        tb = max(sub, (tb // sub) * sub)
        tb = min(tb, B)
    elif B >= 2 * sub:
        # Whole batch would fit in one step, but split into >= 2 steps so the
        # grid can be sharded across both TensorCores on v7x.
        half = (B + 1) // 2
        tb = min(B, ((half + sub - 1) // sub) * sub)
    return int(tb)
    # TODO(synk): for very large N*D that exceeds the VMEM budget even at
    # TB=sub, add a second (sequence-tiled) grid axis with an online-softmax
    # accumulator; not needed for the shapes exercised here.


def attention_forward(z, w1, b1, w2):
    """z: (B, N, D); w1: (D, H); b1: (H,); w2: (H, 1).

    Returns (res (B, D), beta (B, N, 1)) matching the PyTorch module.
    """
    B, N, D = z.shape
    H = w1.shape[1]
    b1_2d = b1.reshape(1, H)
    w2_row = w2.reshape(1, H)               # (H, 1) -> (1, H) row vector

    itemsize = jnp.dtype(z.dtype).itemsize
    TB = _choose_tile_b(B, N, D, H, itemsize)
    num_steps = -(-B // TB)                 # ceil
    B_pad = num_steps * TB
    z_in = jnp.pad(z, ((0, B_pad - B), (0, 0), (0, 0))) if B_pad != B else z

    # Lane-dense output slabs when the natural last dim is not 128-aligned
    # (avoids masked partial stores -- the biggest measured store-side lever).
    flat_res = (D % 128 != 0)
    flat_beta = (N % 128 != 0)

    if flat_res:
        res_shape = jax.ShapeDtypeStruct((num_steps, 1, TB * D), z.dtype)
        res_spec = pl.BlockSpec((1, 1, TB * D), lambda b: (b, 0, 0))
    else:
        res_shape = jax.ShapeDtypeStruct((B_pad, D), z.dtype)
        res_spec = pl.BlockSpec((TB, D), lambda b: (b, 0))
    if flat_beta:
        beta_shape = jax.ShapeDtypeStruct((num_steps, 1, TB * N), jnp.float32)
        beta_spec = pl.BlockSpec((1, 1, TB * N), lambda b: (b, 0, 0))
    else:
        beta_shape = jax.ShapeDtypeStruct((B_pad, N), jnp.float32)
        beta_spec = pl.BlockSpec((TB, N), lambda b: (b, 0))

    cost = pl.CostEstimate(
        flops=int(2 * B_pad * N * D * H + 2 * B_pad * N * H + 2 * B_pad * N * D),
        transcendentals=int(B_pad * N * H + B_pad * N),
        bytes_accessed=int(B_pad * N * D * itemsize
                           + (D * H + 2 * H) * jnp.dtype(w1.dtype).itemsize
                           + B_pad * D * itemsize + B_pad * N * 4),
    )

    kernel = functools.partial(_attention_kernel,
                               unroll_weighted_sum=(N <= 32))

    res_out, beta_out = pl.pallas_call(
        kernel,
        out_shape=(res_shape, beta_shape),
        grid_spec=pltpu.PrefetchScalarGridSpec(
            num_scalar_prefetch=0,
            grid=(num_steps,),
            in_specs=[
                pl.BlockSpec((TB, N, D), lambda b: (b, 0, 0)),  # z batch tile
                pl.BlockSpec((D, H), lambda b: (0, 0)),         # W1 (grid-invariant)
                pl.BlockSpec((1, H), lambda b: (0, 0)),         # b1 (grid-invariant)
                pl.BlockSpec((1, H), lambda b: (0, 0)),         # W2 row (grid-invariant)
            ],
            out_specs=[res_spec, beta_spec],
        ),
        compiler_params=pltpu.CompilerParams(
            dimension_semantics=("parallel",),
            vmem_limit_bytes=48 * 1024 * 1024,   # above 16/32 MiB defaults, below v7x's 64 MiB
        ),
        cost_estimate=cost,
    )(z_in, w1, b1_2d, w2_row)

    res = (res_out.reshape(B_pad, D) if flat_res else res_out)[:B]
    beta = (beta_out.reshape(B_pad, N) if flat_beta else beta_out)[:B][..., None]
    return res, beta


def _reference(z, w1, b1, w2):
    # Pure-JAX reference mirroring the PyTorch forward.
    h = jnp.tanh(jnp.einsum("bnd,dh->bnh", z, w1) + b1)
    w = jnp.einsum("bnh,ho->bno", h, w2)          # (B, N, 1)
    beta = jax.nn.softmax(w, axis=1)
    res = jnp.sum(beta * z, axis=1)
    return res, beta


if __name__ == "__main__":
    B, N, in_size, hidden = 2, 8, 32, 128

    key = jax.random.PRNGKey(0)
    k_z, k_w1, k_b1, k_w2 = jax.random.split(key, 4)

    # Deterministic, PyTorch-Linear-style uniform init (bounds from fan_in).
    z = jax.random.normal(k_z, (B, N, in_size), dtype=jnp.float32)
    lim1 = 1.0 / jnp.sqrt(in_size)
    w1 = jax.random.uniform(k_w1, (in_size, hidden), minval=-lim1, maxval=lim1,
                            dtype=jnp.float32)
    b1 = jax.random.uniform(k_b1, (hidden,), minval=-lim1, maxval=lim1,
                            dtype=jnp.float32)
    lim2 = 1.0 / jnp.sqrt(hidden)
    w2 = jax.random.uniform(k_w2, (hidden, 1), minval=-lim2, maxval=lim2,
                            dtype=jnp.float32)

    res, beta = attention_forward(z, w1, b1, w2)
    jax.block_until_ready((res, beta))

    res_ref, beta_ref = _reference(z, w1, b1, w2)
    assert res.shape == (B, in_size) and beta.shape == (B, N, 1)
    assert jnp.allclose(res, res_ref, atol=1e-5, rtol=1e-3)
    assert jnp.allclose(beta, beta_ref, atol=1e-5, rtol=1e-3)

    print("KERNEL_OK")
</pallas_src>

<mosaic_0001>
module attributes {stable_mosaic.version = 11 : i64} {
  func.func @_attention_kernel(%arg0: i32, %arg1: memref<2x8x32xf32, #tpu.memory_space<vmem>>, %arg2: memref<32x128xf32, #tpu.memory_space<vmem>>, %arg3: memref<1x128xf32, #tpu.memory_space<vmem>>, %arg4: memref<1x128xf32, #tpu.memory_space<vmem>>, %arg5: memref<1x1x64xf32, #tpu.memory_space<vmem>>, %arg6: memref<1x1x16xf32, #tpu.memory_space<vmem>>) attributes {dimension_semantics = [#tpu.dimension_semantics<parallel>], iteration_bounds = array<i64: 1>, scalar_prefetch = 0 : i64, scratch_operands = 0 : i64, tpu.core_type = #tpu.core_type<tc>, window_params = [{transform_indices = @transform_0, window_bounds = array<i64: 2, 8, 32>}, {pipeline_mode = #tpu.pipeline_mode<synchronous>, transform_indices = @transform_1, window_bounds = array<i64: 32, 128>}, {pipeline_mode = #tpu.pipeline_mode<synchronous>, transform_indices = @transform_2, window_bounds = array<i64: 1, 128>}, {pipeline_mode = #tpu.pipeline_mode<synchronous>, transform_indices = @transform_3, window_bounds = array<i64: 1, 128>}, {transform_indices = @transform_4, window_bounds = array<i64: 1, 1, 64>}, {transform_indices = @transform_5, window_bounds = array<i64: 1, 1, 16>}]} {
    %c0 = arith.constant 0 : index
    %c0_0 = arith.constant 0 : index
    %c0_1 = arith.constant 0 : index
    %0 = vector.load %arg1[%c0, %c0_0, %c0_1] : memref<2x8x32xf32, #tpu.memory_space<vmem>>, vector<2x8x32xf32>
    %1 = vector.shape_cast %0 : vector<2x8x32xf32> to vector<16x32xf32>
    %c0_2 = arith.constant 0 : index
    %c0_3 = arith.constant 0 : index
    %2 = vector.load %arg2[%c0_2, %c0_3] : memref<32x128xf32, #tpu.memory_space<vmem>>, vector<32x128xf32>
    %cst = arith.constant dense<0.000000e+00> : vector<16x128xf32>
    %3 = tpu.matmul %1, %2, %cst {dimension_numbers = #tpu.dot_dimension_numbers<[1], [0], [0], [1], [0, 0, 1, 1], [], []>} : vector<16x32xf32>, vector<32x128xf32>, vector<16x128xf32> -> vector<16x128xf32>
    %c0_4 = arith.constant 0 : index
    %c0_5 = arith.constant 0 : index
    %4 = vector.load %arg3[%c0_4, %c0_5] : memref<1x128xf32, #tpu.memory_space<vmem>>, vector<1x128xf32>
    %5 = vector.broadcast %4 : vector<1x128xf32> to vector<16x128xf32>
    %6 = arith.addf %3, %5 : vector<16x128xf32>
    %7 = math.tanh %6 : vector<16x128xf32>
    %c0_6 = arith.constant 0 : index
    %c0_7 = arith.constant 0 : index
    %8 = vector.load %arg4[%c0_6, %c0_7] : memref<1x128xf32, #tpu.memory_space<vmem>>, vector<1x128xf32>
    %9 = vector.broadcast %8 : vector<1x128xf32> to vector<16x128xf32>
    %10 = arith.mulf %7, %9 : vector<16x128xf32>
    %cst_8 = arith.constant dense<0.000000e+00> : vector<16xf32>
    %11 = vector.multi_reduction <add>, %10, %cst_8 [1] : vector<16x128xf32> to vector<16xf32>
    %12 = vector.shape_cast %11 : vector<16xf32> to vector<16x1xf32>
    %13 = vector.shape_cast %12 : vector<16x1xf32> to vector<2x8xf32>
    %cst_9 = arith.constant dense<0xFF800000> : vector<2xf32>
    %14 = vector.multi_reduction <maximumf>, %13, %cst_9 [1] : vector<2x8xf32> to vector<2xf32>
    %15 = vector.shape_cast %14 : vector<2xf32> to vector<2x1xf32>
    %16 = vector.broadcast %15 : vector<2x1xf32> to vector<2x8xf32>
    %17 = arith.subf %13, %16 : vector<2x8xf32>
    %18 = math.exp %17 : vector<2x8xf32>
    %cst_10 = arith.constant dense<0.000000e+00> : vector<2xf32>
    %19 = vector.multi_reduction <add>, %18, %cst_10 [1] : vector<2x8xf32> to vector<2xf32>
    %20 = vector.shape_cast %19 : vector<2xf32> to vector<2x1xf32>
    %21 = vector.broadcast %20 : vector<2x1xf32> to vector<2x8xf32>
    %22 = arith.divf %18, %21 : vector<2x8xf32>
    %cst_11 = arith.constant 0.000000e+00 : f32
    %23 = vector.broadcast %cst_11 : f32 to vector<2x32xf32>
    %24 = vector.extract_strided_slice %22 {offsets = [0, 0], sizes = [2, 1], strides = [1, 1]} : vector<2x8xf32> to vector<2x1xf32>
    %25 = vector.extract_strided_slice %0 {offsets = [0, 0, 0], sizes = [2, 1, 32], strides = [1, 1, 1]} : vector<2x8x32xf32> to vector<2x1x32xf32>
    %26 = vector.shape_cast %25 : vector<2x1x32xf32> to vector<2x32xf32>
    %27 = vector.broadcast %24 : vector<2x1xf32> to vector<2x32xf32>
    %28 = arith.mulf %27, %26 : vector<2x32xf32>
    %29 = arith.addf %23, %28 : vector<2x32xf32>
    %30 = vector.extract_strided_slice %22 {offsets = [0, 1], sizes = [2, 1], strides = [1, 1]} : vector<2x8xf32> to vector<2x1xf32>
    %31 = vector.extract_strided_slice %0 {offsets = [0, 1, 0], sizes = [2, 1, 32], strides = [1, 1, 1]} : vector<2x8x32xf32> to vector<2x1x32xf32>
    %32 = vector.shape_cast %31 : vector<2x1x32xf32> to vector<2x32xf32>
    %33 = vector.broadcast %30 : vector<2x1xf32> to vector<2x32xf32>
    %34 = arith.mulf %33, %32 : vector<2x32xf32>
    %35 = arith.addf %29, %34 : vector<2x32xf32>
    %36 = vector.extract_strided_slice %22 {offsets = [0, 2], sizes = [2, 1], strides = [1, 1]} : vector<2x8xf32> to vector<2x1xf32>
    %37 = vector.extract_strided_slice %0 {offsets = [0, 2, 0], sizes = [2, 1, 32], strides = [1, 1, 1]} : vector<2x8x32xf32> to vector<2x1x32xf32>
    %38 = vector.shape_cast %37 : vector<2x1x32xf32> to vector<2x32xf32>
    %39 = vector.broadcast %36 : vector<2x1xf32> to vector<2x32xf32>
    %40 = arith.mulf %39, %38 : vector<2x32xf32>
    %41 = arith.addf %35, %40 : vector<2x32xf32>
    %42 = vector.extract_strided_slice %22 {offsets = [0, 3], sizes = [2, 1], strides = [1, 1]} : vector<2x8xf32> to vector<2x1xf32>
    %43 = vector.extract_strided_slice %0 {offsets = [0, 3, 0], sizes = [2, 1, 32], strides = [1, 1, 1]} : vector<2x8x32xf32> to vector<2x1x32xf32>
    %44 = vector.shape_cast %43 : vector<2x1x32xf32> to vector<2x32xf32>
    %45 = vector.broadcast %42 : vector<2x1xf32> to vector<2x32xf32>
    %46 = arith.mulf %45, %44 : vector<2x32xf32>
    %47 = arith.addf %41, %46 : vector<2x32xf32>
    %48 = vector.extract_strided_slice %22 {offsets = [0, 4], sizes = [2, 1], strides = [1, 1]} : vector<2x8xf32> to vector<2x1xf32>
    %49 = vector.extract_strided_slice %0 {offsets = [0, 4, 0], sizes = [2, 1, 32], strides = [1, 1, 1]} : vector<2x8x32xf32> to vector<2x1x32xf32>
    %50 = vector.shape_cast %49 : vector<2x1x32xf32> to vector<2x32xf32>
    %51 = vector.broadcast %48 : vector<2x1xf32> to vector<2x32xf32>
    %52 = arith.mulf %51, %50 : vector<2x32xf32>
    %53 = arith.addf %47, %52 : vector<2x32xf32>
    %54 = vector.extract_strided_slice %22 {offsets = [0, 5], sizes = [2, 1], strides = [1, 1]} : vector<2x8xf32> to vector<2x1xf32>
    %55 = vector.extract_strided_slice %0 {offsets = [0, 5, 0], sizes = [2, 1, 32], strides = [1, 1, 1]} : vector<2x8x32xf32> to vector<2x1x32xf32>
    %56 = vector.shape_cast %55 : vector<2x1x32xf32> to vector<2x32xf32>
    %57 = vector.broadcast %54 : vector<2x1xf32> to vector<2x32xf32>
    %58 = arith.mulf %57, %56 : vector<2x32xf32>
    %59 = arith.addf %53, %58 : vector<2x32xf32>
    %60 = vector.extract_strided_slice %22 {offsets = [0, 6], sizes = [2, 1], strides = [1, 1]} : vector<2x8xf32> to vector<2x1xf32>
    %61 = vector.extract_strided_slice %0 {offsets = [0, 6, 0], sizes = [2, 1, 32], strides = [1, 1, 1]} : vector<2x8x32xf32> to vector<2x1x32xf32>
    %62 = vector.shape_cast %61 : vector<2x1x32xf32> to vector<2x32xf32>
    %63 = vector.broadcast %60 : vector<2x1xf32> to vector<2x32xf32>
    %64 = arith.mulf %63, %62 : vector<2x32xf32>
    %65 = arith.addf %59, %64 : vector<2x32xf32>
    %66 = vector.extract_strided_slice %22 {offsets = [0, 7], sizes = [2, 1], strides = [1, 1]} : vector<2x8xf32> to vector<2x1xf32>
    %67 = vector.extract_strided_slice %0 {offsets = [0, 7, 0], sizes = [2, 1, 32], strides = [1, 1, 1]} : vector<2x8x32xf32> to vector<2x1x32xf32>
    %68 = vector.shape_cast %67 : vector<2x1x32xf32> to vector<2x32xf32>
    %69 = vector.broadcast %66 : vector<2x1xf32> to vector<2x32xf32>
    %70 = arith.mulf %69, %68 : vector<2x32xf32>
    %71 = arith.addf %65, %70 : vector<2x32xf32>
    %72 = vector.shape_cast %71 : vector<2x32xf32> to vector<1x1x64xf32>
    %c0_12 = arith.constant 0 : index
    %c0_13 = arith.constant 0 : index
    %c0_14 = arith.constant 0 : index
    %73 = vector.load %arg5[%c0_12, %c0_13, %c0_14] : memref<1x1x64xf32, #tpu.memory_space<vmem>>, vector<1x1x64xf32>
    tpu.vector_store %arg5[%c0_12, %c0_13, %c0_14], %72 {strides = array<i32>} : memref<1x1x64xf32, #tpu.memory_space<vmem>>, vector<1x1x64xf32>,
    %74 = vector.shape_cast %22 : vector<2x8xf32> to vector<1x1x16xf32>
    %c0_15 = arith.constant 0 : index
    %c0_16 = arith.constant 0 : index
    %c0_17 = arith.constant 0 : index
    %75 = vector.load %arg6[%c0_15, %c0_16, %c0_17] : memref<1x1x16xf32, #tpu.memory_space<vmem>>, vector<1x1x16xf32>
    tpu.vector_store %arg6[%c0_15, %c0_16, %c0_17], %74 {strides = array<i32>} : memref<1x1x16xf32, #tpu.memory_space<vmem>>, vector<1x1x16xf32>,
    return
  }
  func.func @transform_0(%arg0: i32) -> (i32, i32, i32) {
    %c0_i32 = arith.constant 0 : i32
    %c0_i32_0 = arith.constant 0 : i32
    %c0_i32_1 = arith.constant 0 : i32
    return %arg0, %c0_i32, %c0_i32_0 : i32, i32, i32
  }
  func.func @transform_1(%arg0: i32) -> (i32, i32) {
    %c0_i32 = arith.constant 0 : i32
    %c0_i32_0 = arith.constant 0 : i32
    %c0_i32_1 = arith.constant 0 : i32
    return %c0_i32, %c0_i32_0 : i32, i32
  }
  func.func @transform_2(%arg0: i32) -> (i32, i32) {
    %c0_i32 = arith.constant 0 : i32
    %c0_i32_0 = arith.constant 0 : i32
    %c0_i32_1 = arith.constant 0 : i32
    return %c0_i32, %c0_i32_0 : i32, i32
  }
  func.func @transform_3(%arg0: i32) -> (i32, i32) {
    %c0_i32 = arith.constant 0 : i32
    %c0_i32_0 = arith.constant 0 : i32
    %c0_i32_1 = arith.constant 0 : i32
    return %c0_i32, %c0_i32_0 : i32, i32
  }
  func.func @transform_4(%arg0: i32) -> (i32, i32, i32) {
    %c0_i32 = arith.constant 0 : i32
    %c0_i32_0 = arith.constant 0 : i32
    %c0_i32_1 = arith.constant 0 : i32
    return %arg0, %c0_i32, %c0_i32_0 : i32, i32, i32
  }
  func.func @transform_5(%arg0: i32) -> (i32, i32, i32) {
    %c0_i32 = arith.constant 0 : i32
    %c0_i32_0 = arith.constant 0 : i32
    %c0_i32_1 = arith.constant 0 : i32
    return %arg0, %c0_i32, %c0_i32_0 : i32, i32, i32
  }
}

</mosaic_0001>

<bundles_post_ra>
// kernel: tpu_custom_call.1
= control target key start
LH: loop header
LB: loop body
LE: loop exit
PB: predicated region body
PF: predicated region fallthrough
CT: control target
= control target key end

     0   :  { %11 = vsyncpa [#allocation3], 0  ;;  %s1612_s0 = inlined_call_operand.hbm [shape: f32[2,8,32], index: 0, kind: input, shape index: {}]   ;;  %s1613_s1 = inlined_call_operand.hbm [shape: f32[32,128], index: 1, kind: input, shape index: {}]   ;;  %s1614_s2 = inlined_call_operand.vmem [shape: f32[1,128], index: 2, kind: input, shape index: {}]   ;;  %s1615_s3 = inlined_call_operand.vmem [shape: f32[1,128], index: 3, kind: input, shape index: {}]   ;;  %s1616_s4 = inlined_call_operand.hbm [shape: f32[1,1,64], index: 4, kind: output, shape index: {0}]   ;;  %s1617_s5 = inlined_call_operand.hbm [shape: f32[1,1,16], index: 5, kind: output, shape index: {1}]  }
   0x1   :  { %12 = vsyncpa [#allocation6], 0 }
   0x2   :  { %13 = vsyncpa [#allocation4], 0 }
   0x3   :  { %14 = vsyncpa [#allocation9], 0  ;;  %s19_s20 = sshll.u32 %s1612_s0, 4  ;;  %s1089_s21 = smov [#allocation2]   ;;  %s20_s20 = int_to_ptr.hbm [resolvable:$true] %s19_s20 }
   0x4   :  { %s21_s22 = sshll.u32 %s1089_s21, 4  ;;  %s32_s25 = sshll.u32 %s1613_s1, 4  ;;  %s22_s22 = int_to_ptr.vmem [resolvable:$true] %s21_s22  ;;  %s33_s25 = int_to_ptr.hbm [resolvable:$true] %s32_s25 }
   0x5   :  { %s1090_s26 = smov 128   ;;  %s1091_s27 = smov 8  }
   0x6   :  { %27 = dma.hbm_to_vmem [thread:$0]  %s20_s20, 256, %s22_s22, [#allocation3], %s1090_s26, %s1090_s26, %s1091_s27  }
   0x7   :  { %s1092_s28 = smov [#allocation5]  }
   0x8   :  { %s34_s29 = sshll.u32 %s1092_s28, 4  ;;  %s35_s29 = int_to_ptr.vmem [resolvable:$true] %s34_s29 }
   0x9   :  { %40 = dma.hbm_to_vmem [thread:$0]  %s33_s25, 512, %s35_s29, [#allocation6], %s1090_s26, %s1090_s26, %s1091_s27  }
   0xa   :  { %1081 = dma.done.wait [#allocation3], 256  }
   0xb   :  { %1082 = vsyncadd [#allocation3], 4294967040 }
   0xc   :  { %1083 = dma.done.wait [#allocation6], 512  }
   0xd   :  { %1084 = vsyncadd [#allocation6], 4294966784  ;;  %v107_v0 = vlaneseq  ;;  %v58_v3 = vld [vmem:[#allocation5 + $0x18] sm:$0xff]  ;;  %v57_v4 = vld [vmem:[#allocation5 + $0x10] sm:$0xff]  ;;  %vm63_vm0 = vcmask 261120   ;;  %vm111_vm1 = vcmask 1041409  }
   0xe   :  { %82 = vmatpush.msra.mxu0 %v58_v3  ;;  %v1141_v5 = vld [vmem:[#allocation2] sm:$0xff]  ;;  %901 = vmatpush.msra.mxu1 %v58_v3  ;;  %v56_v6 = vld [vmem:[#allocation5 + $0x8] sm:$0xff]  ;;  %v55_v8 = vld [vmem:[#allocation5] sm:$0xff]  ;;  %vm114_vm2 = vcmask 58368   ;;  %v1093_v57 = vmov 0   ;;  %s883_s9 = sshll.u32 %s1617_s5, 4  ;;  %s884_s9 = int_to_ptr.hbm [resolvable:$true] %s883_s9 }
   0xf   :  { %v1133_v1 = vshrl.u32 %v107_v0, 7  ;;  %v1144_v7 = vperm.slane %v1141_v5, 0  ;;  %v1146_v9 = vld [vmem:[#allocation2 + $0x8] sm:$0xff]  ;;  %v257_v13 = vperm.slane %v1141_v5, 1  ;;  %v1183_v15 = vperm.slane %v1141_v5, 2  ;;  %s1095_s5 = smov [#allocation7]  }
  0x10   :  { %83 = vmatpush.msra.mxu0 %v57_v4  ;;  %902 = vmatpush.msra.mxu1 %v57_v4  ;;  %v1156_v11 = vperm.slane %v1146_v9, 0  ;;  %v1174_v14 = vperm.slane %v1146_v9, 1  ;;  %v1190_v16 = vperm.slane %v1146_v9, 2  ;;  %v971_v17 = vld [vmem:[%s1614_s2] ss:$0 sm:$0xff]  ;;  %v409_v27 = vperm.slane %v1141_v5, 3 }
  0x11   :  { %v1136_v2 = vadd.s32 8, %v1133_v1  ;;  %916 = vset.pattern.permute.xlu2 %v1133_v1  ;;  %912 = vset.pattern.permute.xlu0 %v1133_v1  ;;  %v1152_v10 = vadd.s32 16, %v1133_v1  ;;  %v1162_v12 = vadd.s32 24, %v1133_v1  ;;  %v972_v22 = vld [vmem:[%s1615_s3] ss:$0 sm:$0xff]  ;;  %v434_v28 = vperm.slane %v1146_v9, 3 }
  0x12   :  { %84 = vmatpush.msra.mxu0 %v56_v6  ;;  %903 = vmatpush.msra.mxu1 %v56_v6  ;;  %v485_v29 = vperm.slane %v1141_v5, 4  ;;  %v1222_v30 = vperm.slane %v1146_v9, 4  ;;  %v1228_v32 = vand.u32 127, %v107_v0  ;;  %v1239_v39 = vperm.slane %v1141_v5, 5  ;;  %s1094_s2 = smov [#allocation8]   ;;  %s870_s10 = sshll.u32 %s1095_s5, 4  ;;  %s871_s10 = int_to_ptr.vmem [resolvable:$true] %s870_s10 }
  0x13   :  { %913 = vset.pattern.permute.xlu1 %v1136_v2  ;;  %v1254_v44 = vperm.slane %v1146_v9, 5  ;;  %v1260_v46 = vperm.slane %v1141_v5, 6  ;;  %v1286_v54 = vperm.slane %v1146_v9, 6  ;;  %s881_s3 = sshll.u32 %s1094_s2, 4  ;;  %vm863_vm11 = vcmask 122880   ;;  %s872_s13 = sshll.u32 %s1616_s4, 4  ;;  %s882_s3 = int_to_ptr.vmem [resolvable:$true] %s881_s3  ;;  %s873_s13 = int_to_ptr.hbm [resolvable:$true] %s872_s13 }
  0x14   :  { %85 = vmatpush.msra.mxu0 %v55_v8  ;;  %904 = vmatpush.msra.mxu1 %v55_v8  ;;  %1620 = vst [vmem:[#allocation14_spill] sm:$0xff] %v1228_v32  ;;  %vm822_vm12 = vcmask 130112   ;;  %vm826_vm13 = vcmask 195712   ;;  %vm830_vm14 = vcmask 261312   ;;  %vm834_vm15 = vcmask 326912  }
  0x15   :  { %899 = vmatmul.msk.f32.vlgmr.msra.gmra.mxu0 %vm63_vm0, %v1141_v5  ;;  %900 = vmatmul.msk.f32.vlgmr.msra.gmra.mxu1 %vm63_vm0, %v1146_v9  ;;  %vm838_vm0 = vcmask 392512  }
  0x19   :  { %211 = vperm.xlu2 %916, %v1156_v11  }
  0x1b   :  { %192 = vperm.xlu1 %913, %v1144_v7  }
  0x21   :  { %920 = vset.pattern.permute.xlu2 %v1152_v10 }
  0x23   :  { %914 = vset.pattern.permute.xlu1 %v1152_v10 }
  0x29   :  { %274 = vperm.xlu2 %920, %v257_v13  }
  0x2b   :  { %198 = vperm.xlu1 %914, %v1144_v7  }
  0x31   :  { %922 = vset.pattern.permute.xlu2 %v1133_v1 }
  0x33   :  { %915 = vset.pattern.permute.xlu1 %v1162_v12 }
  0x39   :  { %287 = vperm.xlu2 %922, %v1174_v14  }
  0x3b   :  { %204 = vperm.xlu1 %915, %v1144_v7  }
  0x41   :  { %924 = vset.pattern.permute.xlu2 %v1162_v12 }
  0x43   :  { %917 = vset.pattern.permute.xlu1 %v1152_v10 }
  0x49   :  { %305 = vperm.xlu2 %924, %v1174_v14  }
  0x4b   :  { %223 = vperm.xlu1 %917, %v1156_v11  }
  0x51   :  { %926 = vset.pattern.permute.xlu2 %v1136_v2 }
  0x53   :  { %918 = vset.pattern.permute.xlu1 %v1162_v12 }
  0x59   :  { %344 = vperm.xlu2 %926, %v1183_v15  }
  0x5b   :  { %229 = vperm.xlu1 %918, %v1156_v11  }
  0x61   :  { %928 = vset.pattern.permute.xlu2 %v1133_v1 }
  0x63   :  { %919 = vset.pattern.permute.xlu1 %v1136_v2 }
  0x69   :  { %363 = vperm.xlu2 %928, %v1190_v16  }
  0x6b   :  { %268 = vperm.xlu1 %919, %v257_v13  }
  0x71   :  { %930 = vset.pattern.permute.xlu2 %v1152_v10 }
  0x73   :  { %921 = vset.pattern.permute.xlu1 %v1162_v12  ;;  %v1281_v52 = vpop.permute.xlu2 %211 }
  0x79   :  { %375 = vperm.xlu2 %930, %v1190_v16  }
  0x7b   :  { %280 = vperm.xlu1 %921, %v257_v13  }
  0x81   :  { %932 = vset.pattern.permute.xlu2 %v1136_v2 }
  0x83   :  { %923 = vset.pattern.permute.xlu1 %v1152_v10  ;;  %v1288_v55 = vpop.permute.xlu2 %274 }
  0x89   :  { %420 = vperm.xlu2 %932, %v409_v27  }
  0x8b   :  { %299 = vperm.xlu1 %923, %v1174_v14  }
  0x8d   :  { %v1230_v33 = vpop.permute.xlu1 %192 }
  0x91   :  { %934 = vset.pattern.permute.xlu2 %v1162_v12 }
  0x92   :  { %v87_v18 = vpop.f32.mrf.mxu0  ;;  %v90_v20 = vpop.f32.mrf.mxu1 }
  0x93   :  { %925 = vset.pattern.permute.xlu1 %v1133_v1  ;;  %v88_v19 = vadd.f32 %v971_v17, %v87_v18  ;;  %v91_v21 = vadd.f32 %v971_v17, %v90_v20  ;;  %v1295_v58 = vpop.permute.xlu2 %287  ;;  %v713_v20 = vperm.slane %v1141_v5, 7  ;;  %v738_v5 = vperm.slane %v1146_v9, 7 }
  0x95   :  { %973 = vtanh.f32 %v88_v19 }
  0x96   :  { %975 = vtanh.f32 %v91_v21 }
  0x99   :  { %432 = vperm.xlu2 %934, %v409_v27  }
  0x9b   :  { %338 = vperm.xlu1 %925, %v1183_v15   ;;  %v974_v23 = vpop.eup %973 }
  0x9c   :  { %v99_v24 = vmul.f32 %v974_v23, %v972_v22  ;;  %v976_v25 = vpop.eup %975 }
  0x9d   :  { %v100_v26 = vmul.f32 %v976_v25, %v972_v22  ;;  %v1241_v40 = vpop.permute.xlu1 %198 }
  0x9e   :  { %101 = vadd.xlane.f32.xlu0 %v99_v24 }
  0xa1   :  { %936 = vset.pattern.permute.xlu2 %v1152_v10 }
  0xa3   :  { %927 = vset.pattern.permute.xlu1 %v1162_v12  ;;  %v1301_v60 = vpop.permute.xlu2 %305 }
  0xa6   :  { %103 = vadd.xlane.f32.xlu0 %v100_v26 }
  0xa9   :  { %451 = vperm.xlu2 %936, %v434_v28  }
  0xab   :  { %356 = vperm.xlu1 %927, %v1183_v15  }
  0xad   :  { %v1244_v41 = vpop.permute.xlu1 %204 }
  0xb1   :  { %938 = vset.pattern.permute.xlu2 %v1133_v1 }
  0xb3   :  { %929 = vset.pattern.permute.xlu1 %v1136_v2  ;;  %v1306_v62 = vpop.permute.xlu2 %344 }
  0xb9   :  { %490 = vperm.xlu2 %938, %v485_v29  }
  0xba   :  { %186 = vperm.xlu0 %912, %v1144_v7  }
  0xbb   :  { %369 = vperm.xlu1 %929, %v1190_v16  }
  0xbd   :  { %v1247_v42 = vpop.permute.xlu1 %223 }
  0xc1   :  { %940 = vset.pattern.permute.xlu2 %v1162_v12 }
  0xc2   :  { %262 = vperm.xlu0 %912, %v257_v13  }
  0xc3   :  { %931 = vset.pattern.permute.xlu1 %v1133_v1 }
  0xc9   :  { %508 = vperm.xlu2 %940, %v485_v29  }
  0xca   :  { %439 = vperm.xlu0 %912, %v434_v28  }
  0xcb   :  { %414 = vperm.xlu1 %931, %v409_v27  }
  0xcd   :  { %v1250_v43 = vpop.permute.xlu1 %229 }
  0xd1   :  { %943 = vset.pattern.permute.xlu2 %v1136_v2 }
  0xd2   :  { %642 = vperm.xlu0 %912, %v1260_v46  }
  0xd3   :  { %933 = vset.pattern.permute.xlu1 %v1152_v10 }
  0xd9   :  { %521 = vperm.xlu2 %943, %v1222_v30  }
  0xda   :  { %952 = vset.pattern.permute.xlu0 %v1136_v2 }
  0xdb   :  { %426 = vperm.xlu1 %933, %v409_v27  }
  0xdd   :  { %v1256_v45 = vpop.permute.xlu1 %268 }
  0xe1   :  { %945 = vset.pattern.permute.xlu2 %v1133_v1 }
  0xe2   :  { %217 = vperm.xlu0 %952, %v1156_v11   ;;  %v1310_v11 = vpop.permute.xlu2 %363 }
  0xe3   :  { %935 = vset.pattern.permute.xlu1 %v1136_v2 }
  0xe9   :  { %566 = vperm.xlu2 %945, %v1239_v39  }
  0xea   :  { %293 = vperm.xlu0 %952, %v1174_v14  }
  0xeb   :  { %445 = vperm.xlu1 %935, %v434_v28  }
  0xed   :  { %v1263_v47 = vpop.permute.xlu1 %280 }
  0xf1   :  { %947 = vset.pattern.permute.xlu2 %v1152_v10 }
  0xf2   :  { %496 = vperm.xlu0 %952, %v485_v29  }
  0xf3   :  { %937 = vset.pattern.permute.xlu1 %v1162_v12 }
  0xf9   :  { %578 = vperm.xlu2 %947, %v1239_v39  }
  0xfa   :  { %673 = vperm.xlu0 %952, %v1286_v54  }
  0xfb   :  { %457 = vperm.xlu1 %937, %v434_v28  }
  0xfd   :  { %v1267_v48 = vpop.permute.xlu1 %299 }
 0x101   :  { %949 = vset.pattern.permute.xlu2 %v1136_v2 }
 0x102   :  { %957 = vset.pattern.permute.xlu0 %v1152_v10 }
 0x103   :  { %939 = vset.pattern.permute.xlu1 %v1152_v10 }
 0x109   :  { %597 = vperm.xlu2 %949, %v1254_v44  }
 0x10a   :  { %350 = vperm.xlu0 %957, %v1183_v15   ;;  %v1316_v15 = vpop.permute.xlu2 %375 }
 0x10d   :  { %v1271_v49 = vpop.permute.xlu1 %338 }
 0x111   :  { %v1224_v31 = vpop.xlane.xlu0 %101  ;;  %951 = vset.pattern.permute.xlu2 %v1162_v12 }
 0x112   :  { %v109_v35 = vperm.slane %v1224_v31, %v1228_v32  ;;  %527 = vperm.xlu0 %957, %v1222_v30   ;;  %v1320_v17 = vpop.permute.xlu2 %420 }
 0x119   :  { %v104_v34 = vpop.xlane.xlu0 %103  ;;  %609 = vperm.xlu2 %951, %v1254_v44  }
 0x11a   :  { %v110_v36 = vperm.slane %v104_v34, %v1228_v32  ;;  %v1324_v18 = vpop.permute.xlu2 %432  ;;  %730 = vperm.xlu0 %957, %v713_v20  }
 0x11c   :  { %v112_v37 = vsel %vm111_vm1, %v110_v36, %v109_v35 }
 0x11d   :  { %v115_v38 = vsel %vm114_vm2, %v112_v37, -inf  ;;  %v1275_v50 = vpop.permute.xlu1 %356 }
 0x121   :  { %954 = vset.pattern.permute.xlu2 %v1152_v10 }
 0x122   :  { %v1328_v19 = vpop.permute.xlu2 %451  ;;  %963 = vset.pattern.permute.xlu0 %v1162_v12 }
 0x125   :  { %116 = vmax.xlane.f32.xlu1 %v115_v38 }
 0x129   :  { %654 = vperm.xlu2 %954, %v1260_v46  }
 0x12a   :  { %v1333_v21 = vpop.permute.xlu2 %490  ;;  %381 = vperm.xlu0 %963, %v1190_v16  }
 0x12c   :  { %v1380_v37 = vpop.permute.xlu0 %186 }
 0x12d   :  { %v1278_v51 = vpop.permute.xlu1 %369 }
 0x131   :  { %956 = vset.pattern.permute.xlu2 %v1133_v1 }
 0x132   :  { %v1337_v22 = vpop.permute.xlu2 %508  ;;  %584 = vperm.xlu0 %963, %v1239_v39  }
 0x134   :  { %v1383_v38 = vpop.permute.xlu0 %262 }
 0x139   :  { %667 = vperm.xlu2 %956, %v1286_v54  }
 0x13a   :  { %v1343_v23 = vpop.permute.xlu2 %521  ;;  %761 = vperm.xlu0 %963, %v738_v5  }
 0x13b   :  { %1623 = vst [vmem:[#allocation17_spill] sm:$0xff] %v1343_v23 }
 0x13d   :  { %v1283_v53 = vpop.permute.xlu1 %414 }
 0x13e   :  { %502 = vperm.xlu1 %939, %v485_v29  }
 0x141   :  { %959 = vset.pattern.permute.xlu2 %v1093_v57 }
 0x142   :  { %970 = vset.pattern.permute.xlu0 %v1093_v57 }
 0x143   :  { %v1347_v24 = vpop.permute.xlu2 %566 }
 0x146   :  { %941 = vset.pattern.permute.xlu1 %v1093_v57 }
 0x14d   :  { %v1292_v56 = vpop.permute.xlu1 %426 }
 0x153   :  { %v1351_v25 = vpop.permute.xlu2 %578 }
 0x15d   :  { %v1299_v59 = vpop.permute.xlu1 %445 }
 0x15e   :  { %1621 = vst [vmem:[#allocation15_spill] sm:$0xff] %v1299_v59 }
 0x163   :  { %v1355_v9 = vpop.permute.xlu2 %597 }
 0x164   :  { %1624 = vst [vmem:[#allocation18_spill] sm:$0xff] %v1355_v9 }
 0x16d   :  { %v1304_v61 = vpop.permute.xlu1 %457 }
 0x16e   :  { %1622 = vst [vmem:[#allocation16_spill] sm:$0xff] %v1304_v61 }
 0x173   :  { %v1359_v16 = vpop.permute.xlu2 %609 }
 0x174   :  { %1625 = vst [vmem:[#allocation19_spill] sm:$0xff] %v1359_v16 }
 0x183   :  { %v1362_v26 = vpop.permute.xlu2 %654 }
 0x184   :  { %1626 = vst [vmem:[#allocation20_spill] sm:$0xff] %v1362_v26 }
 0x193   :  { %v1365_v27 = vpop.permute.xlu2 %667 }
 0x198   :  { %v117_v63 = vpop.xlane.xlu1 %116 }
 0x199   :  { %v119_v0 = vperm.slane %v117_v63, 0  ;;  %v120_v3 = vperm.slane %v117_v63, 1 }
 0x19b   :  { %v123_v4 = vsub.f32 %v1224_v31, %v119_v0  ;;  %v124_v6 = vsub.f32 %v104_v34, %v120_v3 }
 0x19d   :  { %v125_v7 = vmul.f32 1.442695, %v123_v4  ;;  %v127_v8 = vmul.f32 1.442695, %v124_v6 }
 0x19f   :  { %977 = vpow2.f32 %v125_v7 }
 0x1a0   :  { %979 = vpow2.f32 %v127_v8 }
 0x1a5   :  { %v1312_v13 = vpop.eup %977 }
 0x1a6   :  { %v1314_v14 = vpop.eup %979  ;;  %132 = vperm.xlu1 %941, %v1312_v13  }
 0x1a7   :  { %135 = vperm.xlu2 %959, %v1314_v14  }
 0x1ae   :  { %942 = vset.pattern.permute.xlu1 %v1133_v1 }
 0x1af   :  { %960 = vset.pattern.permute.xlu2 %v1162_v12 }
 0x1b0   :  { %v1368_v28 = vpop.permute.xlu1 %502 }
 0x1b6   :  { %515 = vperm.xlu1 %942, %v1222_v30  }
 0x1b7   :  { %685 = vperm.xlu2 %960, %v1286_v54  }
 0x1be   :  { %944 = vset.pattern.permute.xlu1 %v1162_v12 }
 0x1bf   :  { %962 = vset.pattern.permute.xlu2 %v1136_v2 }
 0x1c6   :  { %533 = vperm.xlu1 %944, %v1222_v30  }
 0x1c7   :  { %724 = vperm.xlu2 %962, %v713_v20  }
 0x1ce   :  { %946 = vset.pattern.permute.xlu1 %v1136_v2 }
 0x1cf   :  { %965 = vset.pattern.permute.xlu2 %v1133_v1 }
 0x1d6   :  { %572 = vperm.xlu1 %946, %v1239_v39   ;;  %v1385_v39 = vpop.permute.xlu0 %439 }
 0x1d7   :  { %743 = vperm.xlu2 %965, %v738_v5  }
 0x1de   :  { %948 = vset.pattern.permute.xlu1 %v1133_v1 }
 0x1df   :  { %967 = vset.pattern.permute.xlu2 %v1152_v10 }
 0x1e6   :  { %591 = vperm.xlu1 %948, %v1254_v44  }
 0x1ee   :  { %950 = vset.pattern.permute.xlu1 %v1152_v10 }
 0x1f6   :  { %603 = vperm.xlu1 %950, %v1254_v44  }
 0x1fe   :  { %953 = vset.pattern.permute.xlu1 %v1136_v2 }
 0x201   :  { %v136_v29 = vpop.permute.xlu2 %135 }
 0x202   :  { %v138_v31 = vperm.slane %v136_v29, %v1228_v32 }
 0x206   :  { %648 = vperm.xlu1 %953, %v1260_v46  }
 0x20e   :  { %955 = vset.pattern.permute.xlu1 %v1162_v12 }
 0x216   :  { %660 = vperm.xlu1 %955, %v1260_v46   ;;  %v1394_v46 = vpop.permute.xlu2 %685 }
 0x217   :  { %1627 = vst [vmem:[#allocation21_spill] sm:$0xff] %v1394_v46 }
 0x218   :  { %v133_v30 = vpop.permute.xlu1 %132 }
 0x219   :  { %v137_v34 = vperm.slane %v133_v30, %v1228_v32 }
 0x21b   :  { %v139_v35 = vsel %vm111_vm1, %v138_v31, %v137_v34  ;;  %vm842_vm1 = vcmask 458112  }
 0x21c   :  { %v141_v36 = vsel %vm114_vm2, %v139_v35, 0.0  ;;  %vm846_vm2 = vcmask 523712  }
 0x21d   :  { %142 = vadd.xlane.f32.xlu2 %v141_v36 }
 0x21e   :  { %958 = vset.pattern.permute.xlu1 %v1152_v10  ;;  %v1388_v10 = vpop.permute.xlu0 %642 }
 0x226   :  { %679 = vperm.xlu1 %958, %v1286_v54   ;;  %v1398_v54 = vpop.permute.xlu2 %724 }
 0x227   :  { %1628 = vst [vmem:[#allocation22_spill] sm:$0xff] %v1398_v54 }
 0x22e   :  { %961 = vset.pattern.permute.xlu1 %v1133_v1  ;;  %v1390_v1 = vpop.permute.xlu0 %217 }
 0x231   :  { %v1404_v0 = vpop.permute.xlu2 %743 }
 0x235   :  { %755 = vperm.xlu2 %967, %v738_v5  }
 0x236   :  { %718 = vperm.xlu1 %961, %v713_v20   ;;  %v1392_v44 = vpop.permute.xlu0 %293 }
 0x23d   :  { %969 = vset.pattern.permute.xlu2 %v1093_v57 }
 0x23e   :  { %964 = vset.pattern.permute.xlu1 %v1162_v12  ;;  %v1396_v12 = vpop.permute.xlu1 %515 }
 0x246   :  { %736 = vperm.xlu1 %964, %v713_v20   ;;  %v1402_v63 = vpop.permute.xlu1 %533 }
 0x247   :  { %1629 = vst [vmem:[#allocation23_spill] sm:$0xff] %v1402_v63 }
 0x24e   :  { %966 = vset.pattern.permute.xlu1 %v1136_v2  ;;  %v1400_v2 = vpop.permute.xlu0 %496  ;;  %v1406_v3 = vpop.permute.xlu1 %572 }
 0x256   :  { %749 = vperm.xlu1 %966, %v738_v5  }
 0x258   :  { %v1410_v8 = vpop.permute.xlu1 %591 }
 0x25e   :  { %968 = vset.pattern.permute.xlu1 %v1093_v57  ;;  %v1408_v57 = vpop.permute.xlu0 %673 }
 0x25f   :  { %1630 = vst [vmem:[#allocation24_spill] sm:$0xff] %v1408_v57 }
 0x266   :  { %v1412_v20 = vpop.permute.xlu0 %350 }
 0x268   :  { %v1414_v30 = vpop.permute.xlu1 %603 }
 0x269   :  { %1631 = vst [vmem:[#allocation25_spill] sm:$0xff] %v1414_v30 }
 0x26e   :  { %v1416_v46 = vpop.permute.xlu0 %527 }
 0x26f   :  { %1632 = vst [vmem:[#allocation26_spill] sm:$0xff] %v1416_v46 }
 0x278   :  { %v1418_v23 = vpop.permute.xlu1 %648 }
 0x290   :  { %v143_v4 = vpop.xlane.xlu2 %142 }
 0x291   :  { %v145_v6 = vperm.slane %v143_v4, 0  ;;  %v146_v7 = vperm.slane %v143_v4, 1 }
 0x293   :  { %981 = vrcp.f32 %v145_v6  ;;  %v175_v4 = vand.u32 2147483648, %v146_v7  ;;  %v173_v57 = vand.u32 2147483647, %v146_v7  ;;  %vm169_vm5 = vweird.f32 %v146_v7 }
 0x294   :  { %983 = vrcp.f32 %v146_v7  ;;  %v160_v61 = vand.u32 2147483648, %v145_v6  ;;  %vm154_vm7 = vweird.f32 %v145_v6  ;;  %v158_v30 = vand.u32 2147483647, %v145_v6 }
 0x295   :  { %vm174_vm9 = vcmp.eq.f32.partialorder %v173_v57, 8.507059e+37 }
 0x296   :  { %vm159_vm10 = vcmp.eq.f32.partialorder %v158_v30, 8.507059e+37 }
 0x299   :  { %v982_v5 = vpop.eup %981 }
 0x29a   :  { %v984_v29 = vpop.eup %983  ;;  %v150_v31 = vmul.f32 %v982_v5, %v145_v6  ;;  %vm155_vm4 = vweird.f32 %v982_v5 }
 0x29b   :  { %v165_v34 = vmul.f32 %v984_v29, %v146_v7  ;;  %vm170_vm3 = vweird.f32 %v984_v29  ;;  %vm156_vm8 = vmor %vm154_vm7, %vm155_vm4  ;;  %v1425_v7 = vpop.permute.xlu1 %660 }
 0x29c   :  { %v151_v35 = vsub.f32 1.0, %v150_v31  ;;  %vm171_vm6 = vmor %vm169_vm5, %vm170_vm3  ;;  %v176_v31 = vor.u32 1.1754944e-38, %v175_v4  ;;  %1634 = vst [vmem:[#allocation28_spill] sm:$0xff] %v1425_v7  ;;  %vm849_vm3 = vcmask 516096  }
 0x29d   :  { %v166_v36 = vsub.f32 1.0, %v165_v34 }
 0x29e   :  { %v152_v32 = vmul.f32 %v982_v5, %v151_v35 }
 0x29f   :  { %v167_v16 = vmul.f32 %v984_v29, %v166_v36  ;;  %v161_v36 = vor.u32 1.1754944e-38, %v160_v61 }
 0x2a0   :  { %v153_v63 = vadd.f32 %v982_v5, %v152_v32 }
 0x2a1   :  { %v168_v9 = vadd.f32 %v984_v29, %v167_v16  ;;  %v1423_v16 = vpop.permute.xlu0 %730 }
 0x2a2   :  { %v157_v34 = vsel %vm156_vm8, %v982_v5, %v153_v63  ;;  %1633 = vst [vmem:[#allocation27_spill] sm:$0xff] %v1423_v16 }
 0x2a3   :  { %v172_v59 = vsel %vm171_vm6, %v984_v29, %v168_v9  ;;  %v162_v46 = vsel %vm159_vm10, %v161_v36, %v157_v34 }
 0x2a4   :  { %v177_v35 = vsel %vm174_vm9, %v176_v31, %v172_v59  ;;  %v1428_v26 = vmul.f32 %v1312_v13, %v162_v46 }
 0x2a5   :  { %v1421_v32 = vmul.f32 %v1314_v14, %v177_v35 }
 0x2a6   :  { %v179_v59 = vperm.slane %v1428_v26, 0  ;;  %v255_v61 = vperm.slane %v1428_v26, 1  ;;  %v331_v6 = vperm.slane %v1428_v26, 2  ;;  %v1450_v5 = vperm.slane %v1428_v26, 3 }
 0x2a7   :  { %v1431_v9 = vperm.slane %v1421_v32, 0  ;;  %v1434_v57 = vperm.slane %v1421_v32, 1  ;;  %v1439_v14 = vperm.slane %v1421_v32, 2  ;;  %v1446_v46 = vperm.slane %v1421_v32, 3 }
 0x2a8   :  { %v1457_v4 = vperm.slane %v1421_v32, 4  ;;  %v242_v34 = vmul.f32 %v1244_v41, %v179_v59  ;;  %v318_v35 = vmul.f32 %v1263_v47, %v255_v61  ;;  %v239_v36 = vmul.f32 %v1380_v37, %v179_v59 }
 0x2a9   :  { %v245_v63 = vmul.f32 %v1247_v42, %v1431_v9  ;;  %v321_v13 = vmul.f32 %v1267_v48, %v1434_v57  ;;  %v246_v29 = vmul.f32 %v1250_v43, %v1431_v9  ;;  %v322_v30 = vmul.f32 %v1301_v60, %v1434_v57  ;;  %v1462_v48 = vpop.permute.xlu1 %679  ;;  %v382_v31 = vpop.permute.xlu0 %381 }
 0x2aa   :  { %v1460_v42 = vperm.slane %v1421_v32, 5  ;;  %1635 = vst [vmem:[#allocation29_spill] sm:$0xff] %v1462_v48  ;;  %v315_v43 = vmul.f32 %v1383_v38, %v255_v61  ;;  %v1469_v7 = vmul.f32 %v382_v31, %v1439_v14  ;;  %v397_v16 = vmul.f32 %v1316_v15, %v1439_v14 }
 0x2ab   :  { %v329_v60 = vadd.f32 %v321_v13, %v245_v63  ;;  %v1474_v54 = vperm.slane %v1421_v32, 6  ;;  %v1477_v48 = vperm.slane %v1428_v26, 4  ;;  %v391_v41 = vmul.f32 %v1271_v49, %v331_v6 }
 0x2ac   :  { %1636 = vst [vmem:[#allocation30_spill] sm:$0xff] %v1469_v7  ;;  %v323_v47 = vadd.f32 %v315_v43, %v239_v36  ;;  %v243_v37 = vmul.f32 %v1281_v52, %v1431_v9  ;;  %v1482_v38 = vadd.f32 %v322_v30, %v246_v29  ;;  %v1486_v63 = vmul.f32 %v1328_v19, %v1446_v46 }
 0x2ad   :  { %v394_v15 = vmul.f32 %v1275_v50, %v331_v6  ;;  %v319_v13 = vmul.f32 %v1295_v58, %v1434_v57  ;;  %v326_v31 = vadd.f32 %v318_v35, %v242_v34  ;;  %v1492_v7 = vperm.slane %v1428_v26, 5 }
 0x2ae   :  { %v467_v49 = vmul.f32 %v1283_v53, %v1450_v5  ;;  %v399_v36 = vadd.f32 %v391_v41, %v323_v47  ;;  %v1496_v52 = vadd.f32 %v397_v16, %v329_v60  ;;  %v470_v29 = vmul.f32 %v1324_v18, %v1450_v5 }
 0x2af   :  { %v327_v19 = vadd.f32 %v319_v13, %v243_v37  ;;  %v395_v50 = vmul.f32 %v1310_v11, %v1439_v14  ;;  %v1503_v30 = vperm.slane %v1421_v32, 7  ;;  %v543_v58 = vmul.f32 %v1333_v21, %v1477_v48 }
 0x2b0   :  { %v1508_v34 = vperm.slane %v1428_v26, 6  ;;  %v475_v53 = vadd.f32 %v467_v49, %v399_v36  ;;  %v471_v43 = vmul.f32 %v1385_v39, %v1446_v46  ;;  %v240_v18 = vmul.f32 %v1230_v33, %v179_v59 }
 0x2b1   :  { %v719_v35 = vpop.permute.xlu1 %718  ;;  %v403_v16 = vadd.f32 %v395_v50, %v327_v19  ;;  %v316_v60 = vmul.f32 %v1256_v45, %v255_v61  ;;  %v402_v11 = vadd.f32 %v394_v15, %v326_v31  ;;  %v619_v41 = vmul.f32 %v1347_v24, %v1492_v7 }
 0x2b2   :  { %v1517_v47 = vperm.slane %v1428_v26, 7  ;;  %v551_v21 = vadd.f32 %v543_v58, %v475_v53  ;;  %v547_v13 = vmul.f32 %v1396_v12, %v1457_v4  ;;  %v392_v36 = vmul.f32 %v1306_v62, %v331_v6 }
 0x2b3   :  { %v479_v37 = vadd.f32 %v471_v43, %v403_v16  ;;  %v324_v49 = vadd.f32 %v316_v60, %v240_v18  ;;  %v695_v33 = vmul.f32 %v1388_v10, %v1508_v34  ;;  %v241_v45 = vmul.f32 %v1241_v40, %v179_v59 }
 0x2b4   :  { %v627_v39 = vadd.f32 %v619_v41, %v551_v21  ;;  %v317_v15 = vmul.f32 %v1288_v55, %v255_v61  ;;  %v623_v31 = vmul.f32 %v1410_v8, %v1460_v42  ;;  %v468_v50 = vmul.f32 %v1320_v17, %v1450_v5 }
 0x2b5   :  { %v555_v24 = vadd.f32 %v547_v13, %v479_v37  ;;  %v400_v19 = vadd.f32 %v392_v36, %v324_v49  ;;  %v771_v58 = vmul.f32 %v719_v35, %v1517_v47  ;;  %v393_v53 = vmul.f32 %v1412_v20, %v331_v6  ;;  %v585_v37 = vpop.permute.xlu0 %584 }
 0x2b6   :  { %v703_v12 = vadd.f32 %v695_v33, %v627_v39  ;;  %v325_v62 = vadd.f32 %v317_v15, %v241_v45  ;;  %v699_v40 = vmul.f32 %v1365_v27, %v1474_v54  ;;  %v544_v55 = vmul.f32 %v1400_v2, %v1477_v48 }
 0x2b7   :  { %v631_v16 = vadd.f32 %v623_v31, %v555_v24  ;;  %v476_v10 = vadd.f32 %v468_v50, %v400_v19  ;;  %v478_v59 = vadd.f32 %v470_v29, %v402_v11  ;;  %v469_v17 = vmul.f32 %v1292_v56, %v1450_v5  ;;  %v1642_v24 = vld [vmem:[#allocation27_spill] sm:$0xff]  ;;  %v1643_v19 = vld [vmem:[#allocation17_spill] sm:$0xff] }
 0x2b8   :  { %v779_v8 = vadd.f32 %v771_v58, %v703_v12  ;;  %v401_v61 = vadd.f32 %v393_v53, %v325_v62  ;;  %v775_v35 = vmul.f32 %v1404_v0, %v1503_v30  ;;  %v620_v6 = vmul.f32 %v1406_v3, %v1492_v7  ;;  %v1644_v58 = vld [vmem:[#allocation26_spill] sm:$0xff] }
 0x2b9   :  { %v737_v43 = vpop.permute.xlu1 %736  ;;  %v707_v18 = vadd.f32 %v699_v40, %v631_v16  ;;  %v552_v20 = vadd.f32 %v544_v55, %v476_v10  ;;  %v545_v2 = vmul.f32 %v1368_v28, %v1477_v48  ;;  %v244_v29 = vmul.f32 %v1390_v1, %v1431_v9  ;;  %v1637_v1 = vld [vmem:[#allocation30_spill] sm:$0xff]  ;;  %v1646_v55 = vld [vmem:[#allocation28_spill] sm:$0xff] }
 0x2ba   :  { %796 = vperm.xlu1 %968, %v779_v8   ;;  %v477_v27 = vadd.f32 %v469_v17, %v401_v61  ;;  %v320_v56 = vmul.f32 %v1392_v44, %v1434_v57  ;;  %v546_v5 = vmul.f32 %v1337_v22, %v1477_v48  ;;  %v696_v11 = vmul.f32 %v1418_v23, %v1508_v34  ;;  %v1638_v22 = vld [vmem:[#allocation22_spill] sm:$0xff]  ;;  %v1639_v23 = vld [vmem:[#allocation20_spill] sm:$0xff]  ;;  %v1647_v61 = vld [vmem:[#allocation23_spill] sm:$0xff] }
 0x2bb   :  { %v783_v60 = vadd.f32 %v775_v35, %v707_v18  ;;  %v628_v0 = vadd.f32 %v620_v6, %v552_v20  ;;  %v621_v41 = vmul.f32 %v1351_v25, %v1492_v7  ;;  %v396_v28 = vmul.f32 %v1278_v51, %v1439_v14  ;;  %v1640_v25 = vld [vmem:[#allocation15_spill] sm:$0xff]  ;;  %v1641_v51 = vld [vmem:[#allocation16_spill] sm:$0xff] }
 0x2bc   :  { %v553_v3 = vadd.f32 %v545_v2, %v477_v27  ;;  %v328_v21 = vadd.f32 %v320_v56, %v244_v29  ;;  %v406_v9 = vadd.f32 %v1637_v1, %v1482_v38  ;;  %v554_v44 = vadd.f32 %v546_v5, %v478_v59  ;;  %v1648_v35 = vld [vmem:[#allocation24_spill] sm:$0xff]  ;;  %v1649_v27 = vld [vmem:[#allocation25_spill] sm:$0xff] }
 0x2bd   :  { %808 = vperm.xlu0 %970, %v783_v60   ;;  %v704_v57 = vadd.f32 %v696_v11, %v628_v0  ;;  %v772_v48 = vmul.f32 %v1638_v22, %v1517_v47  ;;  %v697_v49 = vmul.f32 %v1639_v23, %v1508_v34  ;;  %v472_v36 = vmul.f32 %v1640_v25, %v1446_v46  ;;  %v1651_v0 = vld [vmem:[#allocation29_spill] sm:$0xff] }
 0x2be   :  { %v629_v13 = vadd.f32 %v621_v41, %v553_v3  ;;  %v404_v39 = vadd.f32 %v396_v28, %v328_v21  ;;  %v474_v14 = vmul.f32 %v1641_v51, %v1446_v46  ;;  %v481_v38 = vadd.f32 %v1486_v63, %v1496_v52  ;;  %v1645_v63 = vld [vmem:[#allocation18_spill] sm:$0xff]  ;;  %v756_v3 = vpop.permute.xlu2 %755  ;;  %v1652_v21 = vld [vmem:[#allocation21_spill] sm:$0xff] }
 0x2bf   :  { %v622_v33 = vmul.f32 %v585_v37, %v1492_v7  ;;  %v780_v45 = vadd.f32 %v772_v48, %v704_v57  ;;  %v773_v31 = vmul.f32 %v1642_v24, %v1517_v47  ;;  %v548_v50 = vmul.f32 %v1643_v19, %v1457_v4 }
 0x2c0   :  { %v705_v15 = vadd.f32 %v697_v49, %v629_v13  ;;  %v480_v12 = vadd.f32 %v472_v36, %v404_v39  ;;  %v549_v62 = vmul.f32 %v1644_v58, %v1457_v4  ;;  %v482_v16 = vadd.f32 %v474_v14, %v406_v9  ;;  %v762_v9 = vpop.permute.xlu0 %761 }
 0x2c1   :  { %v630_v53 = vadd.f32 %v622_v33, %v554_v44  ;;  %799 = vperm.xlu2 %969, %v780_v45   ;;  %v624_v7 = vmul.f32 %v1645_v63, %v1460_v42  ;;  %v698_v59 = vmul.f32 %v1646_v55, %v1508_v34  ;;  %v774_v8 = vmul.f32 %v737_v43, %v1517_v47  ;;  %v1650_v43 = vld [vmem:[#allocation19_spill] sm:$0xff] }
 0x2c2   :  { %v781_v40 = vadd.f32 %v773_v31, %v705_v15  ;;  %v556_v52 = vadd.f32 %v548_v50, %v480_v12  ;;  %v557_v10 = vadd.f32 %v549_v62, %v481_v38  ;;  %v550_v17 = vmul.f32 %v1647_v61, %v1457_v4 }
 0x2c3   :  { %v700_v20 = vmul.f32 %v1648_v35, %v1474_v54  ;;  %v625_v2 = vmul.f32 %v1649_v27, %v1460_v42  ;;  %v706_v29 = vadd.f32 %v698_v59, %v630_v53  ;;  %v626_v4 = vmul.f32 %v1650_v43, %v1460_v42 }
 0x2c4   :  { %802 = vperm.xlu1 %968, %v781_v40   ;;  %v632_v18 = vadd.f32 %v624_v7, %v556_v52  ;;  %v558_v56 = vadd.f32 %v550_v17, %v482_v16  ;;  %v701_v11 = vmul.f32 %v1651_v0, %v1474_v54  ;;  %v702_v1 = vmul.f32 %v1652_v21, %v1474_v54  ;;  %v1653_v54 = vld [vmem:[#allocation14_spill] sm:$0xff] }
 0x2c5   :  { %857 = vperm.xlu0 %970, %v1421_v32   ;;  %v633_v5 = vadd.f32 %v625_v2, %v557_v10  ;;  %v782_v47 = vadd.f32 %v774_v8, %v706_v29  ;;  %v777_v32 = vmul.f32 %v756_v3, %v1503_v30  ;;  %v778_v22 = vmul.f32 %v762_v9, %v1503_v30 }
 0x2c6   :  { %v708_v34 = vadd.f32 %v700_v20, %v632_v18  ;;  %v634_v41 = vadd.f32 %v626_v4, %v558_v56  ;;  %v820_v36 = vadd.s32 4294967288, %v1653_v54  ;;  %v824_v39 = vadd.s32 4294967280, %v1653_v54 }
 0x2c7   :  { %v709_v28 = vadd.f32 %v701_v11, %v633_v5  ;;  %v828_v24 = vadd.s32 4294967272, %v1653_v54  ;;  %v836_v19 = vadd.s32 4294967256, %v1653_v54  ;;  %v832_v50 = vadd.s32 4294967264, %v1653_v54 }
 0x2c8   :  { %v750_v46 = vpop.permute.xlu1 %749  ;;  %v710_v44 = vadd.f32 %v702_v1, %v634_v41  ;;  %v840_v16 = vadd.s32 4294967248, %v1653_v54  ;;  %v844_v63 = vadd.s32 4294967240, %v1653_v54 }
 0x2c9   :  { %v776_v6 = vmul.f32 %v750_v46, %v1503_v30  ;;  %805 = vperm.xlu2 %969, %v782_v47   ;;  %v785_v57 = vadd.f32 %v777_v32, %v709_v28 }
 0x2ca   :  { %v786_v42 = vadd.f32 %v778_v22, %v710_v44 }
 0x2cb   :  { %v784_v60 = vadd.f32 %v776_v6, %v708_v34 }
 0x2cd   :  { %811 = vperm.xlu1 %968, %v784_v60  }
 0x2d1   :  { %814 = vperm.xlu2 %969, %v785_v57  }
 0x2d5   :  { %817 = vperm.xlu1 %968, %v786_v42  }
 0x2d9   :  { %854 = vperm.xlu2 %969, %v1428_v26  }
 0x31b   :  { %v800_v48 = vpop.permute.xlu2 %799 }
 0x31c   :  { %v821_v15 = vperm.slane %v800_v48, %v820_v36 }
 0x323   :  { %v806_v37 = vpop.permute.xlu2 %805 }
 0x324   :  { %v829_v62 = vperm.slane %v806_v37, %v828_v24 }
 0x32b   :  { %v815_v13 = vpop.permute.xlu2 %814 }
 0x32c   :  { %v797_v23 = vpop.permute.xlu1 %796  ;;  %v841_v10 = vperm.slane %v815_v13, %v840_v16 }
 0x32d   :  { %v819_v38 = vperm.slane %v797_v23, %v1653_v54 }
 0x32f   :  { %v809_v49 = vpop.permute.xlu0 %808  ;;  %v823_v31 = vsel %vm822_vm12, %v821_v15, %v819_v38 }
 0x330   :  { %v833_v40 = vperm.slane %v809_v49, %v832_v50 }
 0x333   :  { %v855_v25 = vpop.permute.xlu2 %854 }
 0x334   :  { %v859_v26 = vperm.slane %v855_v25, %v1653_v54 }
 0x336   :  { %v803_v51 = vpop.permute.xlu1 %802 }
 0x337   :  { %v858_v30 = vpop.permute.xlu0 %857  ;;  %v825_v33 = vperm.slane %v803_v51, %v824_v39 }
 0x338   :  { %v860_v14 = vperm.slane %v858_v30, %v820_v36 }
 0x339   :  { %v827_v12 = vsel %vm826_vm13, %v825_v33, %v823_v31 }
 0x33a   :  { %v861_v45 = vsel %vm822_vm12, %v860_v14, %v859_v26  ;;  %v831_v53 = vsel %vm830_vm14, %v829_v62, %v827_v12 }
 0x33b   :  { %864 = vst.msk [vmem:[#allocation8] sm:$0x1] %vm863_vm11, %v861_v45  ;;  %v835_v7 = vsel %vm834_vm15, %v833_v40, %v831_v53 }
 0x33c   :  { %886 = dma.vmem_to_hbm [thread:$0]  %s882_s3, 16, %s884_s9, [#allocation9]  }
 0x33f   :  { %v812_v58 = vpop.permute.xlu1 %811 }
 0x340   :  { %v837_v46 = vperm.slane %v812_v58, %v836_v19 }
 0x342   :  { %v839_v52 = vsel %vm838_vm0, %v837_v46, %v835_v7 }
 0x343   :  { %v843_v8 = vsel %vm842_vm1, %v841_v10, %v839_v52 }
 0x347   :  { %v818_v55 = vpop.permute.xlu1 %817 }
 0x348   :  { %v845_v59 = vperm.slane %v818_v55, %v844_v63 }
 0x34a   :  { %v847_v61 = vsel %vm846_vm2, %v845_v59, %v843_v8 }
 0x34b   :  { %850 = vst.msk [vmem:[#allocation7] sm:$0x1] %vm849_vm3, %v847_v61 }
 0x34c   :  { %875 = dma.vmem_to_hbm [thread:$0]  %s871_s10, 16, %s873_s13, [#allocation4]  }
 0x34d   :  { %1085 = dma.done.wait [#allocation4], 16  }
 0x34e   :  { %1086 = vsyncadd [#allocation4], 4294967280 }
 0x34f   :  { %1087 = dma.done.wait [#allocation9], 16  }
 0x350   :  { %1088 = vsyncadd [#allocation9], 4294967280 }
 0x351   :  { %895 = vsyncpa [#allocation3], 1 }
 0x352   :  { %896 = vsyncpa [#allocation6], 1 }
 0x353   :  { %897 = vsyncpa [#allocation4], 1 }
 0x354   :  { %898 = vsyncpa [#allocation9], 1 }

</bundles_post_ra>
